<compile_context>
chip_gen: v7x
topology: tpu7x:2x2x1
jax: 0.10.0
libtpu: 0.0.40
codegen_flags: <defaults>
</compile_context>

<pallas_src>
import numpy as np
import jax
import jax.numpy as jnp
from jax import lax
from jax.experimental import pallas as pl
from jax.experimental.pallas import tpu as pltpu


def _sigmoid_ref(v):
    return 1.0 / (1.0 + jnp.exp(-v))


# ----------------------------- Pallas kernel --------------------------------
def _make_kernel(H, W, dw, dwr, cin, cout, t, use_shortcut, tap_dtype):
    HW = H * W
    pow2_w = (W & (W - 1)) == 0

    def _sigmoid(v):
        # exp + approx reciprocal both ride the (otherwise idle) EUP slot,
        # freeing VALU bundles in the VPU-bound Swish / depthwise region.
        return pl.reciprocal(1.0 + jnp.exp(-v), approx=True)

    def kernel(*refs):
        if t != 1:
            x_ref, w1_ref, wdw_ref, wse1_ref, wse2_ref, w3_ref, vec_ref, o_ref = refs
        else:
            x_ref, wdw_ref, wse1_ref, wse2_ref, w3_ref, vec_ref, o_ref = refs

        x = x_ref[0, :cin, :]                          # (cin, HW), matmul dtype

        # packed per-channel vectors (single small DMA stream)
        b1 = vec_ref[:dw, 0:1]                         # (dw, 1)
        b2 = vec_ref[:dw, 1:2]
        bse2 = vec_ref[:dw, 2:3]
        b3 = vec_ref[:cout, 3:4]                       # (cout, 1)
        bse1 = vec_ref[:dwr, 4:5]                      # (dwr, 1)

        # --- expansion 1x1 conv (BN scale folded into weight) + Swish ------
        if t != 1:
            y = jnp.dot(w1_ref[...], x, preferred_element_type=jnp.float32)
            y = y + b1
            y = y * _sigmoid(y)                        # Swish
        else:
            y = x.astype(jnp.float32)

        # --- depthwise 3x3, stride 1, pad 1 (groups=dw), BN scale folded ---
        # Separable column-then-row accumulation: the two horizontal (dx) taps
        # are rolled + masked once, then each dy-row gets one roll + one mask.
        # Boundary masks are lane-only (1, HW) and broadcast over channels.
        lane = lax.broadcasted_iota(jnp.int32, (1, HW), 1)
        w_idx = jnp.bitwise_and(lane, W - 1) if pow2_w else lane % W
        h_ge1 = lane >= W                              # output h >= 1
        h_ltm = lane < (H - 1) * W                     # output h <= H-2
        w_ge1 = w_idx >= 1                             # output w >= 1
        w_ltm = w_idx < (W - 1)                        # output w <= W-2

        wdw = wdw_ref[...]                             # (dw, 9), f32
        y_t = y.astype(tap_dtype)
        y_wm = jnp.where(w_ge1, pltpu.roll(y_t, shift=1, axis=1), 0.0)       # y[h, w-1]
        y_wp = jnp.where(w_ltm, pltpu.roll(y_t, shift=HW - 1, axis=1), 0.0)  # y[h, w+1]

        acc = None
        for dy in (-1, 0, 1):
            k0 = (dy + 1) * 3
            row = (y_wm * wdw[:, k0:k0 + 1]
                   + y_t * wdw[:, k0 + 1:k0 + 2]
                   + y_wp * wdw[:, k0 + 2:k0 + 3])     # f32 accumulation
            if dy == -1:
                row = jnp.where(h_ge1, pltpu.roll(row, shift=W, axis=1), 0.0)
            elif dy == 1:
                row = jnp.where(h_ltm, pltpu.roll(row, shift=HW - W, axis=1), 0.0)
            acc = row if acc is None else acc + row
        y2 = acc + b2                                  # (dw, HW), f32

        # --- squeeze & excite (tiny matvecs, f32) --------------------------
        # TODO(synk): with an HW-tiled grid this global mean must become a
        # two-pass accumulation (pooled sums resident across HW tiles).
        se = jnp.mean(y2, axis=1, keepdims=True)       # (dw, 1) global avg pool
        hh = jnp.dot(wse1_ref[...], se, preferred_element_type=jnp.float32) + bse1
        hh = jnp.maximum(hh, 0.0)                      # BN folded into wse1/bse1
        g = _sigmoid(jnp.dot(wse2_ref[...], hh,
                             preferred_element_type=jnp.float32) + bse2)
        y3 = jnp.clip(y2 * g, 0.0, 6.0)                # SE gate, then ReLU6

        # --- projection 1x1 conv (BN scale folded into weight) -------------
        out = jnp.dot(w3_ref[...], y3.astype(w3_ref.dtype),
                      preferred_element_type=jnp.float32) + b3    # (cout, HW)

        # --- shortcut + single fused, fully dense store ---------------------
        if use_shortcut:
            # x was zero-padded to cout channels host-side, so the residual
            # add covers the full tile and the store below is one unmasked vst
            # (no sublane-partial read-modify-write).
            out = out + x_ref[0].astype(jnp.float32)
        o_ref[0] = out.astype(o_ref.dtype)

    return kernel


# ------------------------------ wrapper --------------------------------------
def linear_bottleneck_pallas(x_nchw, params, *, t, stride, use_shortcut,
                             matmul_dtype=jnp.bfloat16,
                             out_dtype=jnp.bfloat16,
                             tap_dtype=jnp.float32):
    # tap_dtype: keep f32 on v5e (no bf16 VALU/EUP); jnp.bfloat16 halves the
    # depthwise roll/select vreg footprint on v6e / v7x.
    # TODO(synk): stride > 1 depthwise path not implemented (the module's
    # shortcut branch only exists for stride == 1 anyway).
    assert stride == 1
    N, cin, H, W = x_nchw.shape
    HW = H * W
    dw = params["wdw"].shape[1]
    dwr = params["wse1"].shape[1]
    cout = params["w3"].shape[1]
    if use_shortcut:
        # The PyTorch module only uses the shortcut when in_channels <= channels.
        assert cin <= cout, "shortcut requires cin <= cout"

    f32 = jnp.float32
    # NCHW -> (N, C, H*W): channels on sublanes, spatial (lane-dense) on lanes.
    x = x_nchw.reshape(N, cin, HW)
    if use_shortcut and cout > cin:
        # Zero-pad the channel axis to cout so the in-kernel residual + store
        # is one full-tile, unmasked store (no sublane-partial RMW).
        x = jnp.pad(x, ((0, 0), (0, cout - cin), (0, 0)))
    x_ch = x.shape[1]
    x = x.astype(matmul_dtype)

    # Host-side precompute: flip weights to (Cout, Cin) layout, fold BN scales.
    s1, b1 = params["s1"][0], params["b1"][0]
    s2, b2 = params["s2"][0], params["b2"][0]
    sse, bse = params["sse"][0], params["bse"][0]
    s3, b3 = params["s3"][0], params["b3"][0]
    bse1 = params["bse1"][0]
    bse2 = params["bse2"][0]

    w1f = (params["w1"].T * s1[:, None]).astype(matmul_dtype)      # (dw, cin)
    wdwf = (params["wdw"].T * s2[:, None]).astype(f32)             # (dw, 9)
    wse1f = (params["wse1"].T * sse[:, None]).astype(f32)          # (dwr, dw)
    bse1f = bse1 * sse + bse                                       # (dwr,)
    wse2f = params["wse2"].T.astype(f32)                           # (dw, dwr)
    w3f = (params["w3"].T * s3[:, None]).astype(matmul_dtype)      # (cout, dw)

    # Pack the remaining per-channel vectors into one small array (one DMA).
    cmax = max(dw, cout, dwr)

    def col(v):
        return jnp.pad(v.astype(f32), (0, cmax - v.shape[0]))

    vecs = jnp.stack([col(b1), col(b2), col(bse2), col(b3), col(bse1f)], axis=1)

    weights = ([w1f] if t != 1 else []) + [wdwf, wse1f, wse2f, w3f, vecs]

    def full_spec(a):
        z = (0,) * a.ndim
        return pl.BlockSpec(a.shape, lambda n, _z=z: _z)

    kernel = _make_kernel(H, W, dw, dwr, cin, cout, t, use_shortcut, tap_dtype)

    out = pl.pallas_call(
        kernel,
        # bf16 output: halves the output HBM writeback (the following layer's
        # MXU consumes bf16 anyway).
        out_shape=jax.ShapeDtypeStruct((N, cout, HW), out_dtype),
        grid_spec=pltpu.PrefetchScalarGridSpec(
            num_scalar_prefetch=0,
            grid=(N,),
            in_specs=[pl.BlockSpec((1, x_ch, HW), lambda n: (n, 0, 0))]
                     + [full_spec(w) for w in weights],
            out_specs=pl.BlockSpec((1, cout, HW), lambda n: (n, 0, 0)),
        ),
        # Batch axis is embarrassingly parallel -> lets v7x split it over both
        # TensorCores; harmless (single core) on v5e / v6e.
        # TODO(synk): when the HW-tile axis lands, mark it parallel too so each
        # v7x core gets >=3-4 grid steps and DMA is hidden by double-buffering.
        compiler_params=pltpu.CompilerParams(dimension_semantics=("parallel",)),
    )(x, *weights)

    # (N, cout, HW) is already NCHW flattened: plain reshape, no transposes.
    return out.reshape(N, cout, H, W)


# ------------------------- deterministic parameters -------------------------
def init_params(key, cin, cout, t, se_ratio=12):
    dw = cin * t if t != 1 else cin
    dwr = dw // se_ratio
    ks = jax.random.split(key, 11)

    def bn_fold(k, c):
        k1, k2, k3, k4 = jax.random.split(k, 4)
        gamma = jax.random.uniform(k1, (c,), minval=0.5, maxval=1.5)
        beta = jax.random.normal(k2, (c,)) * 0.1
        mean = jax.random.normal(k3, (c,)) * 0.1
        var = jax.random.uniform(k4, (c,), minval=0.5, maxval=1.5)
        s = gamma / jnp.sqrt(var + 1e-5)
        b = beta - mean * s
        return (s.reshape(1, c).astype(jnp.float32),
                b.reshape(1, c).astype(jnp.float32))

    p = {}
    # expansion 1x1 conv weight, HWIO
    p["w1_hwio"] = (jax.random.normal(ks[0], (1, 1, cin, dw)) * 0.2).astype(jnp.float32)
    p["w1"] = p["w1_hwio"][0, 0]
    p["s1"], p["b1"] = bn_fold(ks[1], dw)
    # depthwise 3x3 weight, HWIO with I=1, groups=dw
    p["wdw_hwio"] = (jax.random.normal(ks[2], (3, 3, 1, dw)) * 0.2).astype(jnp.float32)
    p["wdw"] = p["wdw_hwio"].reshape(9, dw)
    p["s2"], p["b2"] = bn_fold(ks[3], dw)
    # SE: conv1x1(dw->dwr, bias) + BN + ReLU + conv1x1(dwr->dw, bias) + Sigmoid
    p["wse1"] = (jax.random.normal(ks[4], (dw, dwr)) * 0.2).astype(jnp.float32)
    p["bse1"] = (jax.random.normal(ks[5], (1, dwr)) * 0.1).astype(jnp.float32)
    p["sse"], p["bse"] = bn_fold(ks[6], dwr)
    p["wse2"] = (jax.random.normal(ks[7], (dwr, dw)) * 0.2).astype(jnp.float32)
    p["bse2"] = (jax.random.normal(ks[8], (1, dw)) * 0.1).astype(jnp.float32)
    # pointwise projection 1x1 conv weight, HWIO
    p["w3_hwio"] = (jax.random.normal(ks[9], (1, 1, dw, cout)) * 0.2).astype(jnp.float32)
    p["w3"] = p["w3_hwio"][0, 0]
    p["s3"], p["b3"] = bn_fold(ks[10], cout)
    return p


# ---------------------------- pure-JAX reference ----------------------------
def ref_forward(x_nchw, p, *, t, stride, use_shortcut):
    x = jnp.transpose(x_nchw, (0, 2, 3, 1)).astype(jnp.float32)   # NHWC
    dn = ("NHWC", "HWIO", "NHWC")
    dw = p["wdw"].shape[1]
    cin = x.shape[-1]
    y = x
    if t != 1:
        y = lax.conv_general_dilated(y, p["w1_hwio"], (1, 1), "VALID", dimension_numbers=dn)
        y = y * p["s1"] + p["b1"]
        y = y * _sigmoid_ref(y)
    y = lax.conv_general_dilated(y, p["wdw_hwio"], (stride, stride), "SAME",
                                 dimension_numbers=dn, feature_group_count=dw)
    y = y * p["s2"] + p["b2"]
    se = jnp.mean(y, axis=(1, 2), keepdims=True)
    h = jnp.einsum("nijc,cd->nijd", se, p["wse1"]) + p["bse1"]
    h = jnp.maximum(h * p["sse"] + p["bse"], 0.0)
    g = _sigmoid_ref(jnp.einsum("nijc,cd->nijd", h, p["wse2"]) + p["bse2"])
    y = jnp.clip(y * g, 0.0, 6.0)
    out = lax.conv_general_dilated(y, p["w3_hwio"], (1, 1), "VALID", dimension_numbers=dn)
    out = out * p["s3"] + p["b3"]
    if use_shortcut:
        out = out.at[..., :cin].add(x)
    return jnp.transpose(out, (0, 3, 1, 2))


if __name__ == "__main__":
    key = jax.random.PRNGKey(0)
    kx, kp = jax.random.split(key)

    # LinearBottleneck(in_channels=4, channels=8, t=6, stride=1, use_se=True, se_ratio=12)
    N, cin, H, W = 2, 4, 16, 16
    cout, t, stride, se_ratio = 8, 6, 1, 12
    use_shortcut = (stride == 1) and (cin <= cout)

    x = jax.random.normal(kx, (N, cin, H, W), dtype=jnp.float32)
    params = init_params(kp, cin, cout, t, se_ratio)

    out = linear_bottleneck_pallas(x, params, t=t, stride=stride,
                                   use_shortcut=use_shortcut)
    out = jax.block_until_ready(out)

    ref = ref_forward(x, params, t=t, stride=stride, use_shortcut=use_shortcut)
    # bf16 MXU operands, bf16 residual source and bf16 output with f32
    # accumulation -> slightly loose tolerance vs. the all-f32 reference.
    np.testing.assert_allclose(np.asarray(out.astype(jnp.float32)),
                               np.asarray(ref), rtol=5e-2, atol=5e-2)
    print("KERNEL_OK")
</pallas_src>

<mosaic_0001>
module attributes {stable_mosaic.version = 11 : i64} {
  func.func @kernel(%arg0: i32, %arg1: memref<1x8x256xbf16, #tpu.memory_space<vmem>>, %arg2: memref<24x4xbf16, #tpu.memory_space<vmem>>, %arg3: memref<24x9xf32, #tpu.memory_space<vmem>>, %arg4: memref<2x24xf32, #tpu.memory_space<vmem>>, %arg5: memref<24x2xf32, #tpu.memory_space<vmem>>, %arg6: memref<8x24xbf16, #tpu.memory_space<vmem>>, %arg7: memref<24x5xf32, #tpu.memory_space<vmem>>, %arg8: memref<1x8x256xbf16, #tpu.memory_space<vmem>>) attributes {dimension_semantics = [#tpu.dimension_semantics<parallel>], iteration_bounds = array<i64: 2>, scalar_prefetch = 0 : i64, scratch_operands = 0 : i64, tpu.core_type = #tpu.core_type<tc>, window_params = [{transform_indices = @transform_0, window_bounds = array<i64: 1, 8, 256>}, {pipeline_mode = #tpu.pipeline_mode<synchronous>, transform_indices = @transform_1, window_bounds = array<i64: 24, 4>}, {pipeline_mode = #tpu.pipeline_mode<synchronous>, transform_indices = @transform_2, window_bounds = array<i64: 24, 9>}, {pipeline_mode = #tpu.pipeline_mode<synchronous>, transform_indices = @transform_3, window_bounds = array<i64: 2, 24>}, {pipeline_mode = #tpu.pipeline_mode<synchronous>, transform_indices = @transform_4, window_bounds = array<i64: 24, 2>}, {pipeline_mode = #tpu.pipeline_mode<synchronous>, transform_indices = @transform_5, window_bounds = array<i64: 8, 24>}, {pipeline_mode = #tpu.pipeline_mode<synchronous>, transform_indices = @transform_6, window_bounds = array<i64: 24, 5>}, {transform_indices = @transform_7, window_bounds = array<i64: 1, 8, 256>}]} {
    %c0 = arith.constant 0 : index
    %c0_0 = arith.constant 0 : index
    %c0_1 = arith.constant 0 : index
    %0 = vector.load %arg1[%c0, %c0_0, %c0_1] : memref<1x8x256xbf16, #tpu.memory_space<vmem>>, vector<1x4x256xbf16>
    %1 = vector.shape_cast %0 : vector<1x4x256xbf16> to vector<4x256xbf16>
    %c0_2 = arith.constant 0 : index
    %c0_3 = arith.constant 0 : index
    %2 = vector.load %arg7[%c0_2, %c0_3] : memref<24x5xf32, #tpu.memory_space<vmem>>, vector<24x1xf32>
    %c0_4 = arith.constant 0 : index
    %c1 = arith.constant 1 : index
    %3 = vector.load %arg7[%c0_4, %c1] : memref<24x5xf32, #tpu.memory_space<vmem>>, vector<24x1xf32>
    %c0_5 = arith.constant 0 : index
    %c2 = arith.constant 2 : index
    %4 = vector.load %arg7[%c0_5, %c2] : memref<24x5xf32, #tpu.memory_space<vmem>>, vector<24x1xf32>
    %c0_6 = arith.constant 0 : index
    %c3 = arith.constant 3 : index
    %5 = vector.load %arg7[%c0_6, %c3] : memref<24x5xf32, #tpu.memory_space<vmem>>, vector<8x1xf32>
    %c0_7 = arith.constant 0 : index
    %c4 = arith.constant 4 : index
    %6 = vector.load %arg7[%c0_7, %c4] : memref<24x5xf32, #tpu.memory_space<vmem>>, vector<2x1xf32>
    %c0_8 = arith.constant 0 : index
    %c0_9 = arith.constant 0 : index
    %7 = vector.load %arg2[%c0_8, %c0_9] : memref<24x4xbf16, #tpu.memory_space<vmem>>, vector<24x4xbf16>
    %cst = arith.constant dense<0.000000e+00> : vector<24x256xf32>
    %8 = tpu.matmul %7, %1, %cst {dimension_numbers = #tpu.dot_dimension_numbers<[1], [0], [0], [1], [0, 0, 1, 1], [], []>} : vector<24x4xbf16>, vector<4x256xbf16>, vector<24x256xf32> -> vector<24x256xf32>
    %9 = vector.broadcast %2 : vector<24x1xf32> to vector<24x256xf32>
    %10 = arith.addf %8, %9 : vector<24x256xf32>
    %cst_10 = arith.constant 0.000000e+00 : f32
    %11 = vector.broadcast %cst_10 : f32 to vector<24x256xf32>
    %12 = arith.subf %11, %10 : vector<24x256xf32>
    %13 = math.exp %12 : vector<24x256xf32>
    %cst_11 = arith.constant 1.000000e+00 : f32
    %14 = vector.broadcast %cst_11 : f32 to vector<24x256xf32>
    %15 = arith.addf %14, %13 : vector<24x256xf32>
    %16 = tpu.reciprocal %15 {approx = true} : vector<24x256xf32> -> vector<24x256xf32>
    %17 = arith.mulf %10, %16 : vector<24x256xf32>
    %18 = tpu.iota {dimensions = array<i32: 1>} : vector<1x256xi32>
    %c15_i32 = arith.constant 15 : i32
    %19 = vector.broadcast %c15_i32 : i32 to vector<1x256xi32>
    %20 = arith.andi %18, %19 : vector<1x256xi32>
    %c16_i32 = arith.constant 16 : i32
    %21 = vector.broadcast %c16_i32 : i32 to vector<1x256xi32>
    %22 = arith.cmpi sge, %18, %21 : vector<1x256xi32>
    %c240_i32 = arith.constant 240 : i32
    %23 = vector.broadcast %c240_i32 : i32 to vector<1x256xi32>
    %24 = arith.cmpi slt, %18, %23 : vector<1x256xi32>
    %c1_i32 = arith.constant 1 : i32
    %25 = vector.broadcast %c1_i32 : i32 to vector<1x256xi32>
    %26 = arith.cmpi sge, %20, %25 : vector<1x256xi32>
    %c15_i32_12 = arith.constant 15 : i32
    %27 = vector.broadcast %c15_i32_12 : i32 to vector<1x256xi32>
    %28 = arith.cmpi slt, %20, %27 : vector<1x256xi32>
    %c0_13 = arith.constant 0 : index
    %c0_14 = arith.constant 0 : index
    %29 = vector.load %arg3[%c0_13, %c0_14] : memref<24x9xf32, #tpu.memory_space<vmem>>, vector<24x9xf32>
    %c1_i32_15 = arith.constant 1 : i32
    %30 = tpu.dynamic_rotate %17 by %c1_i32_15 dim 1 : vector<24x256xf32>, i32 -> vector<24x256xf32>
    %cst_16 = arith.constant 0.000000e+00 : f32
    %31 = vector.shape_cast %26 : vector<1x256xi1> to vector<1x256xi1>
    %32 = vector.broadcast %31 : vector<1x256xi1> to vector<24x256xi1>
    %33 = vector.broadcast %cst_16 : f32 to vector<24x256xf32>
    %34 = arith.select %32, %30, %33 : vector<24x256xi1>, vector<24x256xf32>
    %c255_i32 = arith.constant 255 : i32
    %35 = tpu.dynamic_rotate %17 by %c255_i32 dim 1 : vector<24x256xf32>, i32 -> vector<24x256xf32>
    %cst_17 = arith.constant 0.000000e+00 : f32
    %36 = vector.shape_cast %28 : vector<1x256xi1> to vector<1x256xi1>
    %37 = vector.broadcast %36 : vector<1x256xi1> to vector<24x256xi1>
    %38 = vector.broadcast %cst_17 : f32 to vector<24x256xf32>
    %39 = arith.select %37, %35, %38 : vector<24x256xi1>, vector<24x256xf32>
    %40 = vector.extract_strided_slice %29 {offsets = [0, 0], sizes = [24, 1], strides = [1, 1]} : vector<24x9xf32> to vector<24x1xf32>
    %41 = vector.broadcast %40 : vector<24x1xf32> to vector<24x256xf32>
    %42 = arith.mulf %34, %41 : vector<24x256xf32>
    %43 = vector.extract_strided_slice %29 {offsets = [0, 1], sizes = [24, 1], strides = [1, 1]} : vector<24x9xf32> to vector<24x1xf32>
    %44 = vector.broadcast %43 : vector<24x1xf32> to vector<24x256xf32>
    %45 = arith.mulf %17, %44 : vector<24x256xf32>
    %46 = arith.addf %42, %45 : vector<24x256xf32>
    %47 = vector.extract_strided_slice %29 {offsets = [0, 2], sizes = [24, 1], strides = [1, 1]} : vector<24x9xf32> to vector<24x1xf32>
    %48 = vector.broadcast %47 : vector<24x1xf32> to vector<24x256xf32>
    %49 = arith.mulf %39, %48 : vector<24x256xf32>
    %50 = arith.addf %46, %49 : vector<24x256xf32>
    %c16_i32_18 = arith.constant 16 : i32
    %51 = tpu.dynamic_rotate %50 by %c16_i32_18 dim 1 : vector<24x256xf32>, i32 -> vector<24x256xf32>
    %cst_19 = arith.constant 0.000000e+00 : f32
    %52 = vector.shape_cast %22 : vector<1x256xi1> to vector<1x256xi1>
    %53 = vector.broadcast %52 : vector<1x256xi1> to vector<24x256xi1>
    %54 = vector.broadcast %cst_19 : f32 to vector<24x256xf32>
    %55 = arith.select %53, %51, %54 : vector<24x256xi1>, vector<24x256xf32>
    %56 = vector.extract_strided_slice %29 {offsets = [0, 3], sizes = [24, 1], strides = [1, 1]} : vector<24x9xf32> to vector<24x1xf32>
    %57 = vector.broadcast %56 : vector<24x1xf32> to vector<24x256xf32>
    %58 = arith.mulf %34, %57 : vector<24x256xf32>
    %59 = vector.extract_strided_slice %29 {offsets = [0, 4], sizes = [24, 1], strides = [1, 1]} : vector<24x9xf32> to vector<24x1xf32>
    %60 = vector.broadcast %59 : vector<24x1xf32> to vector<24x256xf32>
    %61 = arith.mulf %17, %60 : vector<24x256xf32>
    %62 = arith.addf %58, %61 : vector<24x256xf32>
    %63 = vector.extract_strided_slice %29 {offsets = [0, 5], sizes = [24, 1], strides = [1, 1]} : vector<24x9xf32> to vector<24x1xf32>
    %64 = vector.broadcast %63 : vector<24x1xf32> to vector<24x256xf32>
    %65 = arith.mulf %39, %64 : vector<24x256xf32>
    %66 = arith.addf %62, %65 : vector<24x256xf32>
    %67 = arith.addf %55, %66 : vector<24x256xf32>
    %68 = vector.extract_strided_slice %29 {offsets = [0, 6], sizes = [24, 1], strides = [1, 1]} : vector<24x9xf32> to vector<24x1xf32>
    %69 = vector.broadcast %68 : vector<24x1xf32> to vector<24x256xf32>
    %70 = arith.mulf %34, %69 : vector<24x256xf32>
    %71 = vector.extract_strided_slice %29 {offsets = [0, 7], sizes = [24, 1], strides = [1, 1]} : vector<24x9xf32> to vector<24x1xf32>
    %72 = vector.broadcast %71 : vector<24x1xf32> to vector<24x256xf32>
    %73 = arith.mulf %17, %72 : vector<24x256xf32>
    %74 = arith.addf %70, %73 : vector<24x256xf32>
    %75 = vector.extract_strided_slice %29 {offsets = [0, 8], sizes = [24, 1], strides = [1, 1]} : vector<24x9xf32> to vector<24x1xf32>
    %76 = vector.broadcast %75 : vector<24x1xf32> to vector<24x256xf32>
    %77 = arith.mulf %39, %76 : vector<24x256xf32>
    %78 = arith.addf %74, %77 : vector<24x256xf32>
    %c240_i32_20 = arith.constant 240 : i32
    %79 = tpu.dynamic_rotate %78 by %c240_i32_20 dim 1 : vector<24x256xf32>, i32 -> vector<24x256xf32>
    %cst_21 = arith.constant 0.000000e+00 : f32
    %80 = vector.shape_cast %24 : vector<1x256xi1> to vector<1x256xi1>
    %81 = vector.broadcast %80 : vector<1x256xi1> to vector<24x256xi1>
    %82 = vector.broadcast %cst_21 : f32 to vector<24x256xf32>
    %83 = arith.select %81, %79, %82 : vector<24x256xi1>, vector<24x256xf32>
    %84 = arith.addf %67, %83 : vector<24x256xf32>
    %85 = vector.broadcast %3 : vector<24x1xf32> to vector<24x256xf32>
    %86 = arith.addf %84, %85 : vector<24x256xf32>
    %cst_22 = arith.constant dense<0.000000e+00> : vector<24xf32>
    %87 = vector.multi_reduction <add>, %86, %cst_22 [1] : vector<24x256xf32> to vector<24xf32>
    %88 = vector.shape_cast %87 : vector<24xf32> to vector<24x1xf32>
    %cst_23 = arith.constant 2.560000e+02 : f32
    %89 = vector.broadcast %cst_23 : f32 to vector<24x1xf32>
    %90 = arith.divf %88, %89 : vector<24x1xf32>
    %c0_24 = arith.constant 0 : index
    %c0_25 = arith.constant 0 : index
    %91 = vector.load %arg4[%c0_24, %c0_25] : memref<2x24xf32, #tpu.memory_space<vmem>>, vector<2x24xf32>
    %cst_26 = arith.constant dense<0.000000e+00> : vector<2x1xf32>
    %92 = tpu.matmul %91, %90, %cst_26 {dimension_numbers = #tpu.dot_dimension_numbers<[1], [0], [0], [1], [0, 0, 1, 1], [], []>} : vector<2x24xf32>, vector<24x1xf32>, vector<2x1xf32> -> vector<2x1xf32>
    %93 = arith.addf %92, %6 : vector<2x1xf32>
    %cst_27 = arith.constant 0.000000e+00 : f32
    %94 = vector.broadcast %cst_27 : f32 to vector<2x1xf32>
    %95 = arith.maximumf %93, %94 : vector<2x1xf32>
    %c0_28 = arith.constant 0 : index
    %c0_29 = arith.constant 0 : index
    %96 = vector.load %arg5[%c0_28, %c0_29] : memref<24x2xf32, #tpu.memory_space<vmem>>, vector<24x2xf32>
    %cst_30 = arith.constant dense<0.000000e+00> : vector<24x1xf32>
    %97 = tpu.matmul %96, %95, %cst_30 {dimension_numbers = #tpu.dot_dimension_numbers<[1], [0], [0], [1], [0, 0, 1, 1], [], []>} : vector<24x2xf32>, vector<2x1xf32>, vector<24x1xf32> -> vector<24x1xf32>
    %98 = arith.addf %97, %4 : vector<24x1xf32>
    %cst_31 = arith.constant 0.000000e+00 : f32
    %99 = vector.broadcast %cst_31 : f32 to vector<24x1xf32>
    %100 = arith.subf %99, %98 : vector<24x1xf32>
    %101 = math.exp %100 : vector<24x1xf32>
    %cst_32 = arith.constant 1.000000e+00 : f32
    %102 = vector.broadcast %cst_32 : f32 to vector<24x1xf32>
    %103 = arith.addf %102, %101 : vector<24x1xf32>
    %104 = tpu.reciprocal %103 {approx = true} : vector<24x1xf32> -> vector<24x1xf32>
    %105 = vector.broadcast %104 : vector<24x1xf32> to vector<24x256xf32>
    %106 = arith.mulf %86, %105 : vector<24x256xf32>
    %cst_33 = arith.constant 0.000000e+00 : f32
    %cst_34 = arith.constant 6.000000e+00 : f32
    %107 = vector.broadcast %cst_33 : f32 to vector<24x256xf32>
    %108 = arith.maximumf %107, %106 : vector<24x256xf32>
    %109 = vector.broadcast %cst_34 : f32 to vector<24x256xf32>
    %110 = arith.minimumf %109, %108 : vector<24x256xf32>
    %c0_35 = arith.constant 0 : index
    %c0_36 = arith.constant 0 : index
    %111 = vector.load %arg6[%c0_35, %c0_36] : memref<8x24xbf16, #tpu.memory_space<vmem>>, vector<8x24xbf16>
    %112 = arith.truncf %110 : vector<24x256xf32> to vector<24x256xbf16>
    %cst_37 = arith.constant dense<0.000000e+00> : vector<8x256xf32>
    %113 = tpu.matmul %111, %112, %cst_37 {dimension_numbers = #tpu.dot_dimension_numbers<[1], [0], [0], [1], [0, 0, 1, 1], [], []>} : vector<8x24xbf16>, vector<24x256xbf16>, vector<8x256xf32> -> vector<8x256xf32>
    %114 = vector.broadcast %5 : vector<8x1xf32> to vector<8x256xf32>
    %115 = arith.addf %113, %114 : vector<8x256xf32>
    %c0_38 = arith.constant 0 : index
    %c0_39 = arith.constant 0 : index
    %c0_40 = arith.constant 0 : index
    %116 = vector.load %arg1[%c0_38, %c0_39, %c0_40] : memref<1x8x256xbf16, #tpu.memory_space<vmem>>, vector<1x8x256xbf16>
    %117 = vector.shape_cast %116 : vector<1x8x256xbf16> to vector<8x256xbf16>
    %118 = arith.extf %117 : vector<8x256xbf16> to vector<8x256xf32>
    %119 = arith.addf %115, %118 : vector<8x256xf32>
    %120 = arith.truncf %119 : vector<8x256xf32> to vector<8x256xbf16>
    %c0_41 = arith.constant 0 : index
    %c0_42 = arith.constant 0 : index
    %c0_43 = arith.constant 0 : index
    %121 = vector.load %arg8[%c0_41, %c0_42, %c0_43] : memref<1x8x256xbf16, #tpu.memory_space<vmem>>, vector<1x8x256xbf16>
    %122 = vector.shape_cast %121 : vector<1x8x256xbf16> to vector<8x256xbf16>
    %123 = vector.shape_cast %120 : vector<8x256xbf16> to vector<1x8x256xbf16>
    tpu.vector_store %arg8[%c0_41, %c0_42, %c0_43], %123 {strides = array<i32>} : memref<1x8x256xbf16, #tpu.memory_space<vmem>>, vector<1x8x256xbf16>,
    return
  }
  func.func @transform_0(%arg0: i32) -> (i32, i32, i32) {
    %c0_i32 = arith.constant 0 : i32
    %c0_i32_0 = arith.constant 0 : i32
    %c0_i32_1 = arith.constant 0 : i32
    return %arg0, %c0_i32, %c0_i32_0 : i32, i32, i32
  }
  func.func @transform_1(%arg0: i32) -> (i32, i32) {
    %c0_i32 = arith.constant 0 : i32
    %c0_i32_0 = arith.constant 0 : i32
    %c0_i32_1 = arith.constant 0 : i32
    return %c0_i32, %c0_i32_0 : i32, i32
  }
  func.func @transform_2(%arg0: i32) -> (i32, i32) {
    %c0_i32 = arith.constant 0 : i32
    %c0_i32_0 = arith.constant 0 : i32
    %c0_i32_1 = arith.constant 0 : i32
    return %c0_i32, %c0_i32_0 : i32, i32
  }
  func.func @transform_3(%arg0: i32) -> (i32, i32) {
    %c0_i32 = arith.constant 0 : i32
    %c0_i32_0 = arith.constant 0 : i32
    %c0_i32_1 = arith.constant 0 : i32
    return %c0_i32, %c0_i32_0 : i32, i32
  }
  func.func @transform_4(%arg0: i32) -> (i32, i32) {
    %c0_i32 = arith.constant 0 : i32
    %c0_i32_0 = arith.constant 0 : i32
    %c0_i32_1 = arith.constant 0 : i32
    return %c0_i32, %c0_i32_0 : i32, i32
  }
  func.func @transform_5(%arg0: i32) -> (i32, i32) {
    %c0_i32 = arith.constant 0 : i32
    %c0_i32_0 = arith.constant 0 : i32
    %c0_i32_1 = arith.constant 0 : i32
    return %c0_i32, %c0_i32_0 : i32, i32
  }
  func.func @transform_6(%arg0: i32) -> (i32, i32) {
    %c0_i32 = arith.constant 0 : i32
    %c0_i32_0 = arith.constant 0 : i32
    %c0_i32_1 = arith.constant 0 : i32
    return %c0_i32, %c0_i32_0 : i32, i32
  }
  func.func @transform_7(%arg0: i32) -> (i32, i32, i32) {
    %c0_i32 = arith.constant 0 : i32
    %c0_i32_0 = arith.constant 0 : i32
    %c0_i32_1 = arith.constant 0 : i32
    return %arg0, %c0_i32, %c0_i32_0 : i32, i32, i32
  }
}

</mosaic_0001>

<bundles_post_ra>
// kernel: tpu_custom_call.1
= control target key start
LH: loop header
LB: loop body
LE: loop exit
PB: predicated region body
PF: predicated region fallthrough
CT: control target
= control target key end

     0   :  { %12 = vsyncpa [#allocation3], 0  ;;  %s2000_s0 = inlined_call_operand.vmem [shape: bf16[2,8,256], index: 0, kind: input, shape index: {}]   ;;  %s2001_s1 = inlined_call_operand.vmem [shape: bf16[24,4], index: 1, kind: input, shape index: {}]   ;;  %s2002_s2 = inlined_call_operand.vmem [shape: f32[24,9], index: 2, kind: input, shape index: {}]   ;;  %s2003_s3 = inlined_call_operand.vmem [shape: f32[2,24], index: 3, kind: input, shape index: {}]   ;;  %s2004_s4 = inlined_call_operand.vmem [shape: f32[24,2], index: 4, kind: input, shape index: {}]   ;;  %s2005_s5 = inlined_call_operand.vmem [shape: bf16[8,24], index: 5, kind: input, shape index: {}]   ;;  %s2006_s6 = inlined_call_operand.vmem [shape: f32[24,5], index: 6, kind: input, shape index: {}]   ;;  %s2007_s7 = inlined_call_operand.hbm [shape: bf16[2,8,256], index: 7, kind: output, shape index: {}]  }
   0x1   :  { %14 = vsyncpa [#allocation3 + $0x1], 0  ;;  %s1481_s24 = smov 0   ;;  %s1483_s25 = smov 0  }
   0x2   :  { %s1485_s26 = smov 0   ;;  %s1487_s27 = smov 0  }
   0x3 LB: > { %s1502_s28 = sadd.s32 4294967295, %s1420_s27   ;;  %s1172_s29 = sadd.s32 4294967294, %s1420_s27   ;;  %s1420_s27 = sphi %s1487_s27, %s2021_s27   ;;  %s1416_s26 = sphi %s1485_s26, %s2020_s26   ;;  %s1412_s25 = sphi %s1483_s25, %s2019_s25   ;;  %s1408_s24 = sphi %s1481_s24, %s2018_s24  }
   0x4   : > { %s1506_s30 = sadd.s32 1, %s1420_s27   ;;  %s179_s8 = sadd.s32 1, %s1416_s26 }
   0x5   : > { %s176_s9 = ssub.s32 %s1420_s27, %s1506_s30  ;;  %p189_p0 = scmp.ne.s32.totalorder %s1416_s26, %s1412_s25 }
   0x6   : > { %p177_p1 = scmp.eq.s32.totalorder %s176_s9, 0  ;;  %p190_p2 = scmp.eq.s32.totalorder %s1502_s28, 1 }
   0x7   : > { %p195_p3 = scmp.ne.s32.totalorder %s1412_s25, %s1408_s24  ;;  %p196_p4 = scmp.eq.s32.totalorder %s1172_s29, 1 }
   0x8   : > { %s1517_s10 = scalar_select %p177_p1, %s1416_s26, %s179_s8  }
   0x9   : > { %p1519_p5 = por %p190_p2, %p189_p0  ;;  %p1523_p6 = por %p196_p4, %p195_p3 }
   0xa   : > { %p1175_p7 = scmp.ge.s32.totalorder %s1420_s27, 1  ;;  %p240_p8 = scmp.lt.s32.totalorder %s1420_s27, 3 }
   0xc   : > { %p241_p9 = pnand %p1175_p7, %p240_p8 }
   0xd   : > { %p272_p10 = scmp.lt.s32.totalorder (!%p241_p9), %s1502_s28, 1  ;;  %v1422_v0 = vmov (!%p241_p9), 0   ;;  %v1535_v1 = vld [vmem:[%s2006_s6 + $0x10] sm:$0xff] (!%p241_p9)  ;;  %v1543_v2 = vld [vmem:[%s2006_s6] sm:$0xff] (!%p241_p9)  ;;  %v1554_v4 = vld [vmem:[%s2006_s6 + $0x8] sm:$0xff] (!%p241_p9)  ;;  %vm321_vm0 = vcmask (!%p241_p9), 1041408  }
   0xe   : > { %244 = sbr.rel (%p241_p9) target bundleno = 1539 (0x603), region = 48  ;;  %360 = vmatprep.mubr.bf16.mxu0 (!%p241_p9), %v1422_v0  ;;  %1291 = vset.pattern.permute.xlu1 (!%p241_p9), %v1422_v0  ;;  %v1548_v3 = vld [vmem:[%s2002_s2] sm:$0xff] (!%p241_p9)  ;;  %vm314_vm1 = vcmask (!%p241_p9), 31744   ;;  %v1423_v10 = vmov (!%p241_p9), 1   ;;  %v1574_v11 = vld [vmem:[%s2002_s2 + $0x8] sm:$0xff] (!%p241_p9)  ;;  %v1424_v12 = vmov (!%p241_p9), 2  }
   0xf   : > { %298 = vperm.xlu1 (!%p241_p9), %1291, %v1535_v1   ;;  %1290 = vset.pattern.permute.xlu0 (!%p241_p9), %v1422_v0  ;;  %v1320_v9 = vld [vmem:[%s2001_s1] sm:$0xff] (!%p241_p9)   ;;  %v1425_v13 = vmov (!%p241_p9), 7   ;;  %v1321_v14 = vld [vmem:[%s2001_s1 + $0x8] ss:$0 sps:$4 sm:$0xff] (!%p241_p9)   ;;  %v1426_v15 = vmov (!%p241_p9), 6   ;;  %v1594_v16 = vld [vmem:[%s2002_s2 + $0x10] sm:$0xff] (!%p241_p9) }
  0x10   : > { %288 = vperm.xlu0 (!%p241_p9), %1290, %v1543_v2   ;;  %v1427_v17 = vmov (!%p241_p9), 8   ;;  %v1428_v18 = vmov (!%p241_p9), 3   ;;  %v1429_v19 = vmov (!%p241_p9), 4   ;;  %s1431_s21 = smov (!%p241_p9), 1   ;;  %s1433_s22 = smov (!%p241_p9), 16   ;;  %vm1436_vm12 = vmmov (!%p241_p9), 0  }
  0x11   : > { %s1434_s23 = smov (!%p241_p9), 112   ;;  %s1438_s13 = smov (!%p241_p9), 124   ;;  %vm796_vm13 = vcmask (!%p241_p9), 195584   ;;  %vm883_vm14 = vcmask (!%p241_p9), 15360   ;;  %vm1036_vm15 = vcmask (!%p241_p9), 1043456  }
  0x12   : > { %s1439_s16 = smov (!%p241_p9), 126   ;;  %s269_s9 = sand.u32 (!%p241_p9), 1, %s1412_s25  }
  0x13   : > { %491 = vperm.xlu1 (!%p241_p9), %1291, %v1548_v3   ;;  %s1201_s14 = sshll.u32 (!%p241_p9), %s1502_s28, 7  ;;  %s1099_s19 = scalar_lea.sflag (!%p241_p9), [#allocation3], %s269_s9 }
  0x14   : > { %293 = vperm.xlu0 (!%p241_p9), %1290, %v1554_v4  }
  0x15   : > { %s273_s15 = scalar_select %p272_p10, %s1502_s28, 1 }
  0x16   : > { %s1440_s28 = smov [#allocation2]  }
  0x17   : > { %s1199_s20 = sshll.u32 %s273_s15, 3  ;;  %1292 = vset.pattern.permute.xlu1 %v1423_v10 }
  0x18   : > { %s1559_s8 = scalar_lea.vmem %s2000_s0, %s1199_s20  ;;  %511 = vperm.xlu1 %1292, %v1548_v3   ;;  %1293 = vset.pattern.permute.xlu0 %v1423_v10  ;;  %s1430_s20 = smov 127  }
  0x19   : > { %v278_v5 = vld [vmem:[%s1559_s8] sm:$0x33]  ;;  %515 = vperm.xlu0 %1293, %v1574_v11  }
  0x1a   : > { %v1182_v6 = vcombine.high %v278_v5, %v278_v5  ;;  %v1181_v7 = vcombine.low %v278_v5, %v278_v5 }
  0x1c   : > { %1183 = vmatprep.subr.msk.bf16.mxu0 %vm321_vm0, %v1182_v6  ;;  %v323_v8 = vsel %vm321_vm0, %v1181_v7, 0  ;;  %1294 = vset.pattern.permute.xlu1 %v1424_v12 }
  0x1d   : > { %329 = vmatpush1.bf16.msra.mxu0 %v323_v8  ;;  %535 = vperm.xlu1 %1294, %v1548_v3  }
  0x1e   : > { %1297 = vset.pattern.permute.xlu0 %v1425_v13 }
  0x1f   : > { %682 = vperm.xlu0 %1297, %v1574_v11  }
  0x20   : > { %1184 = vmatmul.mubr.msk.bf16.vlgmr.msra.gmra.mrb[0].mxu0 %vm314_vm1, %v1320_v9 }
  0x21   : > { %370 = vmatprep.mubr.bf16.mxu0 %v1422_v0  ;;  %539 = vperm.xlu1 %1294, %v1574_v11  }
  0x23   : > { %1298 = vset.pattern.permute.xlu0 %v1422_v0 }
  0x24   : > { %496 = vperm.xlu0 %1298, %v1574_v11  }
  0x25   : > { %1295 = vset.pattern.permute.xlu1 %v1426_v15 }
  0x26   : > { %664 = vperm.xlu1 %1295, %v1574_v11  }
  0x28   : > { %1185 = vmatmul.mubr.msk.bf16.gmra.mrb[4].mxu0 %vm314_vm1, %v1321_v14  ;;  %501 = vperm.xlu0 %1298, %v1594_v16  }
  0x29   : > { %1075 = vmatprep.mubr.bf16.mxu0 %v1422_v0 }
  0x2a   : > { %1296 = vset.pattern.permute.xlu1 %v1425_v13 }
  0x2b   : > { %678 = vperm.xlu1 %1296, %v1548_v3  }
  0x2c   : > { %1300 = vset.pattern.permute.xlu0 %v1426_v15 }
  0x2d   : > { %660 = vperm.xlu0 %1300, %v1548_v3  }
  0x2f   : > { %1299 = vset.pattern.permute.xlu1 %v1427_v17 }
  0x30   : > { %702 = vperm.xlu1 %1299, %v1548_v3  }
  0x31   : > { %668 = vperm.xlu0 %1300, %v1594_v16  }
  0x34   : > { %706 = vperm.xlu1 %1299, %v1574_v11  }
  0x35   : > { %1307 = vset.pattern.permute.xlu0 %v1429_v19 }
  0x38   : > { %1301 = vset.pattern.permute.xlu1 %v1423_v10 }
  0x39   : > { %519 = vperm.xlu1 %1301, %v1594_v16  }
  0x3d   : > { %1302 = vset.pattern.permute.xlu1 %v1424_v12 }
  0x3e   : > { %543 = vperm.xlu1 %1302, %v1594_v16  }
  0x42   : > { %1303 = vset.pattern.permute.xlu1 %v1425_v13 }
  0x43   : > { %686 = vperm.xlu1 %1303, %v1594_v16  }
  0x47   : > { %1304 = vset.pattern.permute.xlu1 %v1427_v17  ;;  %v1432_v17 = vmov 5  }
  0x48   : > { %710 = vperm.xlu1 %1304, %v1594_v16  }
  0x4c   : > { %1305 = vset.pattern.permute.xlu1 %v1428_v18 }
  0x8e   : > { %v299_v37 = vpop.permute.xlu1 %298 }
  0x8f   : > { %v289_v20 = vpop.permute.xlu0 %288 }
  0x93   : > { %v294_v24 = vpop.permute.xlu0 %293 }
  0xf3   : > { %v362_v21 = vpop.f32.mrb[0].mxu0 }
  0xf4   : > { %v363_v22 = vadd.f32 %v362_v21, %v289_v20  ;;  %v364_v23 = vpop.f32.mrb[1].mxu0 }
  0xf5   : > { %v365_v25 = vadd.f32 %v364_v23, %v289_v20  ;;  %v366_v26 = vpop.f32.mrb[2].mxu0  ;;  %v492_v20 = vpop.permute.xlu1 %491 }
  0xf6   : > { %v379_v27 = vsub.f32 0.0, %v363_v22  ;;  %v367_v28 = vadd.f32 %v366_v26, %v294_v24  ;;  %v368_v29 = vpop.f32.mrb[3].mxu0 }
  0xf7   : > { %v380_v30 = vsub.f32 0.0, %v365_v25  ;;  %v369_v31 = vadd.f32 %v368_v29, %v294_v24  ;;  %v1660_v24 = vpop.permute.xlu0 %515 }
  0xf8   : > { %v385_v32 = vmul.f32 1.442695, %v379_v27  ;;  %v381_v33 = vsub.f32 0.0, %v367_v28 }
  0xf9   : > { %v387_v34 = vmul.f32 1.442695, %v380_v30  ;;  %v382_v35 = vsub.f32 0.0, %v369_v31  ;;  %v512_v21 = vpop.permute.xlu1 %511 }
  0xfa   : > { %1322 = vpow2.f32 %v385_v32  ;;  %v389_v36 = vmul.f32 1.442695, %v381_v33 }
  0xfb   : > { %1324 = vpow2.f32 %v387_v34  ;;  %v372_v38 = vpop.f32.mrb[4].mxu0  ;;  %v391_v39 = vmul.f32 1.442695, %v382_v35 }
  0xfc   : > { %1326 = vpow2.f32 %v389_v36  ;;  %v373_v40 = vadd.f32 %v372_v38, %v299_v37  ;;  %v374_v41 = vpop.f32.mrb[5].mxu0 }
  0xfd   : > { %v375_v42 = vadd.f32 %v374_v41, %v299_v37  ;;  %v376_v43 = vpop.f32.mrb[6].mxu0  ;;  %1328 = vpow2.f32 %v391_v39 }
  0xfe   : > { %v383_v44 = vsub.f32 0.0, %v373_v40  ;;  %v377_v45 = vpop.f32.mrb[7].mxu0 }
  0xff   : > { %v384_v46 = vsub.f32 0.0, %v375_v42 }
 0x100   : > { %v393_v47 = vmul.f32 1.442695, %v383_v44 }
 0x101   : > { %v395_v48 = vmul.f32 1.442695, %v384_v46 }
 0x102   : > { %1330 = vpow2.f32 %v393_v47 }
 0x103   : > { %1332 = vpow2.f32 %v395_v48 }
 0x104   : > { %v1323_v49 = vpop.eup %1322 }
 0x105   : > { %v1325_v50 = vpop.eup %1324  ;;  %v397_v51 = vadd.f32 1.0, %v1323_v49 }
 0x106   : > { %v1327_v52 = vpop.eup %1326  ;;  %v398_v53 = vadd.f32 1.0, %v1325_v50 }
 0x107   : > { %1334 = vrcp.f32 %v397_v51  ;;  %v399_v54 = vadd.f32 1.0, %v1327_v52  ;;  %v1329_v55 = vpop.eup %1328 }
 0x108   : > { %1336 = vrcp.f32 %v398_v53  ;;  %v400_v57 = vadd.f32 1.0, %v1329_v55 }
 0x109   : > { %1338 = vrcp.f32 %v399_v54 }
 0x10a   : > { %1340 = vrcp.f32 %v400_v57 }
 0x10c   : > { %v1331_v56 = vpop.eup %1330 }
 0x10d   : > { %v1333_v58 = vpop.eup %1332  ;;  %v401_v59 = vadd.f32 1.0, %v1331_v56 }
 0x10e   : > { %v402_v61 = vadd.f32 1.0, %v1333_v58 }
 0x10f   : > { %1342 = vrcp.f32 %v401_v59 }
 0x110   : > { %1344 = vrcp.f32 %v402_v61 }
 0x111   : > { %v1335_v60 = vpop.eup %1334 }
 0x112   : > { %v1609_v62 = vmul.f32 %v1335_v60, %v363_v22  ;;  %v1337_v63 = vpop.eup %1336 }
 0x113   : > { %v1613_v5 = vmul.f32 %v1337_v63, %v365_v25  ;;  %v1339_v6 = vpop.eup %1338 }
 0x114   : > { %460 = vrot.lane.b32.xlu1 %v1609_v62, %s1430_s20  ;;  %431 = vrot.lane.b32.xlu0 %v1609_v62, %s1431_s21  ;;  %v1617_v7 = vmul.f32 %v1339_v6, %v367_v28  ;;  %v1341_v8 = vpop.eup %1340  ;;  %v415_v28 = vlaneseq  ;;  %v522_v51 = vmul.f32 %v512_v21, %v1609_v62 }
 0x115   : > { %v1621_v12 = vmul.f32 %v1341_v8, %v369_v31  ;;  %v523_v57 = vmul.f32 %v512_v21, %v1613_v5 }
 0x116   : > { %v1674_v31 = vand.u32 127, %v415_v28 }
 0x118   : > { %466 = vrot.lane.b32.xlu1 %v1613_v5, %s1430_s20  ;;  %437 = vrot.lane.b32.xlu0 %v1613_v5, %s1431_s21  ;;  %v1679_v33 = vadd.s32 128, %v1674_v31  ;;  %v418_v35 = vand.u32 15, %v1674_v31  ;;  %vm472_vm2 = vcmp.lt.s32.totalorder %v1674_v31, 127  ;;  %vm443_vm3 = vcmp.lt.s32.totalorder %v1674_v31, 1 }
 0x119   : > { %v1343_v9 = vpop.eup %1342  ;;  %vm570_vm8 = vcmp.lt.s32.totalorder %v1674_v31, 16  ;;  %vm420_vm9 = vcmp.ge.s32.totalorder %v1674_v31, 16  ;;  %vm737_vm10 = vcmp.lt.s32.totalorder %v1674_v31, 112  ;;  %v282_v31 = vld [vmem:[%s2006_s6] sm:$0x3] }
 0x11a   : > { %v1345_v13 = vpop.eup %1344  ;;  %v1625_v14 = vmul.f32 %v1343_v9, %v373_v40  ;;  %v419_v36 = vand.u32 15, %v1679_v33  ;;  %vm1687_vm4 = vcmp.ge.s32.totalorder %v418_v35, 1  ;;  %vm1695_vm6 = vcmp.lt.s32.totalorder %v418_v35, 15 }
 0x11b   : > { %v1627_v15 = vmul.f32 %v1345_v13, %v375_v42  ;;  %vm423_vm11 = vcmp.lt.s32.totalorder %v1679_v33, 240 }
 0x11c   : > { %433 = vrot.lane.b32.xlu1 %v1617_v7, %s1431_s21  ;;  %462 = vrot.lane.b32.xlu0 %v1617_v7, %s1430_s20  ;;  %vm1691_vm5 = vcmp.ge.s32.totalorder %v419_v36, 1  ;;  %vm1713_vm7 = vcmp.lt.s32.totalorder %v419_v36, 15 }
 0x120   : > { %439 = vrot.lane.b32.xlu1 %v1621_v12, %s1431_s21  ;;  %468 = vrot.lane.b32.xlu0 %v1621_v12, %s1430_s20 }
 0x124   : > { %441 = vrot.lane.b32.xlu1 %v1627_v15, %s1431_s21  ;;  %435 = vrot.lane.b32.xlu0 %v1625_v14, %s1431_s21  ;;  %s1362_s21 = sshll.u32 %s1440_s28, 4  ;;  %s1363_s21 = int_to_ptr.vmem [resolvable:$false] %s1362_s21 }
 0x128   : > { %470 = vrot.lane.b32.xlu1 %v1627_v15, %s1430_s20  ;;  %464 = vrot.lane.b32.xlu0 %v1625_v14, %s1430_s20 }
 0x12c   : > { %592 = vperm.xlu1 %1305, %v1574_v11   ;;  %610 = vperm.xlu0 %1307, %v1574_v11  }
 0x130   : > { %1306 = vset.pattern.permute.xlu1 %v1429_v19  ;;  %1308 = vset.pattern.permute.xlu0 %v1428_v18 }
 0x131   : > { %606 = vperm.xlu1 %1306, %v1548_v3   ;;  %588 = vperm.xlu0 %1308, %v1548_v3  }
 0x135   : > { %1309 = vset.pattern.permute.xlu1 %v1432_v17  ;;  %596 = vperm.xlu0 %1308, %v1594_v16  }
 0x136   : > { %630 = vperm.xlu1 %1309, %v1548_v3   ;;  %v536_v3 = vpop.permute.xlu1 %535 }
 0x139   : > { %1312 = vset.pattern.permute.xlu0 %v1423_v10 }
 0x13a   : > { %634 = vperm.xlu1 %1309, %v1574_v11   ;;  %761 = vperm.xlu0 %1312, %v1543_v2   ;;  %v1652_v11 = vpop.permute.xlu1 %539 }
 0x13e   : > { %1310 = vset.pattern.permute.xlu1 %v1429_v19  ;;  %1315 = vset.pattern.permute.xlu0 %v1422_v0  ;;  %v1654_v19 = vpop.permute.xlu1 %664 }
 0x13f   : > { %614 = vperm.xlu1 %1310, %v1594_v16  }
 0x142   : > { %v1656_v22 = vpop.permute.xlu1 %678 }
 0x143   : > { %1311 = vset.pattern.permute.xlu1 %v1432_v17  ;;  %v689_v21 = vmul.f32 %v1656_v22, %v1609_v62 }
 0x144   : > { %638 = vperm.xlu1 %1311, %v1594_v16  }
 0x146   : > { %v1658_v23 = vpop.permute.xlu1 %702 }
 0x148   : > { %1313 = vset.pattern.permute.xlu1 %v1423_v10  ;;  %v1664_v10 = vpop.permute.xlu0 %682 }
 0x149   : > { %765 = vperm.xlu1 %1313, %v1554_v4   ;;  %v691_v40 = vmul.f32 %v1664_v10, %v1617_v7 }
 0x14a   : > { %v1662_v16 = vpop.permute.xlu1 %706 }
 0x14c   : > { %v497_v26 = vpop.permute.xlu0 %496 }
 0x14d   : > { %769 = vperm.xlu1 %1313, %v1535_v1  }
 0x14e   : > { %v1666_v25 = vpop.permute.xlu1 %519 }
 0x151   : > { %1314 = vset.pattern.permute.xlu1 %v1422_v0  ;;  %v1670_v0 = vpop.permute.xlu0 %501 }
 0x152   : > { %v1668_v27 = vpop.permute.xlu1 %543 }
 0x155   : > { %v661_v30 = vpop.permute.xlu0 %660 }
 0x156   : > { %v1672_v29 = vpop.permute.xlu1 %686 }
 0x159   : > { %v1681_v34 = vpop.permute.xlu0 %668 }
 0x15a   : > { %v1676_v32 = vpop.permute.xlu1 %710 }
 0x186   : > { %v461_v37 = vpop.permute.xlu1 %460  ;;  %v432_v38 = vpop.permute.xlu0 %431 }
 0x18a   : > { %v467_v42 = vpop.permute.xlu1 %466  ;;  %v438_v43 = vpop.permute.xlu0 %437 }
 0x18b   : > { %v473_v44 = vsel %vm472_vm2, %v461_v37, %v467_v42  ;;  %v444_v45 = vsel %vm443_vm3, %v432_v38, %v438_v43  ;;  %v447_v46 = vsel %vm443_vm3, %v438_v43, %v432_v38  ;;  %v476_v52 = vsel %vm472_vm2, %v467_v42, %v461_v37 }
 0x18c   : > { %v1707_v47 = vsel %vm1687_vm4, %v447_v46, 0.0  ;;  %v1711_v48 = vsel %vm1691_vm5, %v444_v45, 0.0  ;;  %v1719_v50 = vsel %vm1695_vm6, %v473_v44, 0.0  ;;  %v1730_v60 = vsel %vm1713_vm7, %v476_v52, 0.0 }
 0x18d   : > { %v504_v53 = vmul.f32 %v492_v20, %v1707_v47  ;;  %v505_v54 = vmul.f32 %v492_v20, %v1711_v48  ;;  %v546_v58 = vmul.f32 %v536_v3, %v1719_v50  ;;  %v671_v61 = vmul.f32 %v661_v30, %v1707_v47 }
 0x18e   : > { %v434_v55 = vpop.permute.xlu1 %433  ;;  %v463_v56 = vpop.permute.xlu0 %462  ;;  %v547_v28 = vmul.f32 %v536_v3, %v1730_v60  ;;  %v524_v37 = vmul.f32 %v1660_v24, %v1617_v7  ;;  %v672_v38 = vmul.f32 %v661_v30, %v1711_v48 }
 0x18f   : > { %v528_v59 = vadd.f32 %v522_v51, %v504_v53  ;;  %v529_v9 = vadd.f32 %v523_v57, %v505_v54  ;;  %v695_v52 = vadd.f32 %v689_v21, %v671_v61  ;;  %v690_v53 = vmul.f32 %v1656_v22, %v1613_v5 }
 0x191   : > { %v552_v8 = vadd.f32 %v546_v58, %v528_v59  ;;  %v553_v51 = vadd.f32 %v547_v28, %v529_v9  ;;  %v696_v58 = vadd.f32 %v690_v53, %v672_v38  ;;  %v714_v9 = vmul.f32 %v1658_v23, %v1730_v60 }
 0x192   : > { %v440_v63 = vpop.permute.xlu1 %439  ;;  %v469_v6 = vpop.permute.xlu0 %468 }
 0x193   : > { %v445_v13 = vsel %vm443_vm3, %v434_v55, %v440_v63  ;;  %v448_v17 = vsel %vm443_vm3, %v440_v63, %v434_v55  ;;  %v474_v20 = vsel %vm472_vm2, %v463_v56, %v469_v6  ;;  %558 = vrot.lane.b32.xlu1 %v552_v8, %s1433_s22  ;;  %v477_v44 = vsel %vm472_vm2, %v469_v6, %v463_v56 }
 0x194   : > { %v1744_v35 = vsel %vm1687_vm4, %v448_v17, 0.0  ;;  %v1748_v36 = vsel %vm1691_vm5, %v445_v13, 0.0  ;;  %v1757_v3 = vsel %vm1695_vm6, %v474_v20, 0.0  ;;  %v525_v55 = vmul.f32 %v1660_v24, %v1621_v12 }
 0x195   : > { %v506_v42 = vmul.f32 %v497_v26, %v1744_v35  ;;  %v507_v43 = vmul.f32 %v497_v26, %v1748_v36  ;;  %v713_v26 = vmul.f32 %v1658_v23, %v1719_v50  ;;  %v548_v56 = vmul.f32 %v1652_v11, %v1757_v3 }
 0x196   : > { %v442_v45 = vpop.permute.xlu1 %441  ;;  %v436_v46 = vpop.permute.xlu0 %435  ;;  %v1775_v57 = vsel %vm1713_vm7, %v477_v44, 0.0  ;;  %v673_v24 = vmul.f32 %v1654_v19, %v1744_v35  ;;  %v527_v23 = vmul.f32 %v1666_v25, %v1627_v15  ;;  %v674_v28 = vmul.f32 %v1654_v19, %v1748_v36 }
 0x197   : > { %v446_v30 = vsel %vm443_vm3, %v436_v46, %v442_v45  ;;  %v530_v54 = vadd.f32 %v524_v37, %v506_v42  ;;  %564 = vrot.lane.b32.xlu1 %v553_v51, %s1433_s22  ;;  %v719_v6 = vadd.f32 %v713_v26, %v695_v52  ;;  %v531_v8 = vadd.f32 %v525_v55, %v507_v43 }
 0x198   : > { %v1779_v22 = vsel %vm1691_vm5, %v446_v30, 0.0  ;;  %v549_v17 = vmul.f32 %v1652_v11, %v1775_v57  ;;  %v720_v37 = vadd.f32 %v714_v9, %v696_v58  ;;  %v449_v11 = vsel %vm443_vm3, %v442_v45, %v436_v46 }
 0x199   : > { %v554_v63 = vadd.f32 %v548_v56, %v530_v54  ;;  %v509_v20 = vmul.f32 %v1670_v0, %v1779_v22  ;;  %v697_v42 = vadd.f32 %v691_v40, %v673_v24  ;;  %v692_v43 = vmul.f32 %v1664_v10, %v1621_v12 }
 0x19a   : > { %v471_v59 = vpop.permute.xlu1 %470  ;;  %v465_v61 = vpop.permute.xlu0 %464  ;;  %v555_v38 = vadd.f32 %v549_v17, %v531_v8  ;;  %v715_v44 = vmul.f32 %v1662_v16, %v1757_v3  ;;  %v676_v51 = vmul.f32 %v1681_v34, %v1779_v22  ;;  %v694_v46 = vmul.f32 %v1672_v29, %v1627_v15 }
 0x19b   : > { %v478_v13 = vsel %vm472_vm2, %v471_v59, %v465_v61  ;;  %560 = vrot.lane.b32.xlu0 %v554_v63, %s1433_s22  ;;  %725 = vrot.lane.b32.xlu1 %v719_v6, %s1434_s23  ;;  %v475_v19 = vsel %vm472_vm2, %v465_v61, %v471_v59  ;;  %v533_v45 = vadd.f32 %v527_v23, %v509_v20  ;;  %v458_v10 = vsel %vm1687_vm4, %v449_v11, 0.0 }
 0x19c   : > { %v1795_v21 = vsel %vm1713_vm7, %v478_v13, 0.0  ;;  %v721_v53 = vadd.f32 %v715_v44, %v697_v42  ;;  %v698_v54 = vadd.f32 %v692_v43, %v674_v28  ;;  %v487_v55 = vsel %vm1695_vm6, %v475_v19, 0.0 }
 0x19d   : > { %v551_v49 = vmul.f32 %v1668_v27, %v1795_v21  ;;  %v718_v52 = vmul.f32 %v1676_v32, %v1795_v21  ;;  %v716_v26 = vmul.f32 %v1662_v16, %v1775_v57  ;;  %v508_v56 = vmul.f32 %v1670_v0, %v458_v10 }
 0x19e   : > { %v700_v39 = vadd.f32 %v694_v46, %v676_v51  ;;  %v526_v58 = vmul.f32 %v1666_v25, %v1625_v14  ;;  %v550_v24 = vmul.f32 %v1668_v27, %v487_v55  ;;  %v675_v41 = vmul.f32 %v1681_v34, %v458_v10 }
 0x19f   : > { %566 = vrot.lane.b32.xlu0 %v555_v38, %s1433_s22  ;;  %731 = vrot.lane.b32.xlu1 %v720_v37, %s1434_s23  ;;  %v557_v30 = vadd.f32 %v551_v49, %v533_v45  ;;  %v722_v59 = vadd.f32 %v716_v26, %v698_v54  ;;  %v693_v0 = vmul.f32 %v1672_v29, %v1625_v14 }
 0x1a0   : > { %v724_v61 = vadd.f32 %v718_v52, %v700_v39  ;;  %v532_v16 = vadd.f32 %v526_v58, %v508_v56  ;;  %v717_v63 = vmul.f32 %v1676_v32, %v487_v55 }
 0x1a1   : > { %v699_v25 = vadd.f32 %v693_v0, %v675_v41 }
 0x1a2   : > { %v556_v6 = vadd.f32 %v550_v24, %v532_v16 }
 0x1a3   : > { %727 = vrot.lane.b32.xlu0 %v721_v53, %s1434_s23  ;;  %568 = vrot.lane.b32.xlu1 %v557_v30, %s1433_s22  ;;  %v723_v27 = vadd.f32 %v717_v63, %v699_v25 }
 0x1a7   : > { %733 = vrot.lane.b32.xlu0 %v722_v59, %s1434_s23  ;;  %735 = vrot.lane.b32.xlu1 %v724_v61, %s1434_s23 }
 0x1ab   : > { %v593_v8 = vpop.permute.xlu1 %592  ;;  %v611_v9 = vpop.permute.xlu0 %610  ;;  %562 = vrot.lane.b32.xlu0 %v556_v6, %s1433_s22  ;;  %s1364_s22 = scalar_lea.vmem %s1363_s21, 256 }
 0x1ac   : > { %v601_v32 = vmul.f32 %v593_v8, %v1744_v35  ;;  %v602_v23 = vmul.f32 %v593_v8, %v1748_v36  ;;  %v619_v28 = vmul.f32 %v611_v9, %v1617_v7  ;;  %v620_v37 = vmul.f32 %v611_v9, %v1621_v12 }
 0x1ae   : > { %v625_v44 = vadd.f32 %v619_v28, %v601_v32 }
 0x1af   : > { %729 = vrot.lane.b32.xlu0 %v723_v27, %s1434_s23 }
 0x1b0   : > { %v607_v34 = vpop.permute.xlu1 %606  ;;  %v589_v13 = vpop.permute.xlu0 %588 }
 0x1b1   : > { %v617_v40 = vmul.f32 %v607_v34, %v1609_v62  ;;  %v618_v17 = vmul.f32 %v607_v34, %v1613_v5  ;;  %v599_v20 = vmul.f32 %v589_v13, %v1707_v47  ;;  %v600_v29 = vmul.f32 %v589_v13, %v1711_v48 }
 0x1b2   : > { %v626_v48 = vadd.f32 %v620_v37, %v602_v23 }
 0x1b3   : > { %v623_v49 = vadd.f32 %v617_v40, %v599_v20  ;;  %v624_v38 = vadd.f32 %v618_v17, %v600_v29 }
 0x1b4   : > { %v597_v12 = vpop.permute.xlu0 %596 }
 0x1b5   : > { %v631_v11 = vpop.permute.xlu1 %630 }
 0x1b6   : > { %v641_v42 = vmul.f32 %v631_v11, %v1719_v50  ;;  %v642_v62 = vmul.f32 %v631_v11, %v1730_v60  ;;  %v603_v50 = vmul.f32 %v597_v12, %v458_v10  ;;  %v604_v60 = vmul.f32 %v597_v12, %v1779_v22 }
 0x1b8   : > { %v647_v5 = vadd.f32 %v641_v42, %v623_v49  ;;  %v648_v43 = vadd.f32 %v642_v62, %v624_v38 }
 0x1b9   : > { %v635_v47 = vpop.permute.xlu1 %634  ;;  %v762_v24 = vpop.permute.xlu0 %761 }
 0x1ba   : > { %v643_v35 = vmul.f32 %v635_v47, %v1757_v3  ;;  %v644_v36 = vmul.f32 %v635_v47, %v1775_v57 }
 0x1bc   : > { %v649_v51 = vadd.f32 %v643_v35, %v625_v44  ;;  %v650_v7 = vadd.f32 %v644_v36, %v626_v48 }
 0x1be   : > { %v615_v19 = vpop.permute.xlu1 %614 }
 0x1bf   : > { %v621_v45 = vmul.f32 %v615_v19, %v1625_v14  ;;  %v622_v46 = vmul.f32 %v615_v19, %v1627_v15 }
 0x1c1   : > { %v627_v53 = vadd.f32 %v621_v45, %v603_v50  ;;  %v628_v30 = vadd.f32 %v622_v46, %v604_v60 }
 0x1c3   : > { %v639_v52 = vpop.permute.xlu1 %638 }
 0x1c4   : > { %v645_v54 = vmul.f32 %v639_v52, %v487_v55  ;;  %v646_v26 = vmul.f32 %v639_v52, %v1795_v21 }
 0x1c6   : > { %v651_v3 = vadd.f32 %v645_v54, %v627_v53  ;;  %v652_v56 = vadd.f32 %v646_v26, %v628_v30  ;;  %v1435_v54 = vmov 0.0|0.0   ;;  %v1437_v26 = vmov 0.0  }
 0x1c7   : > { %1230 = vmatprep.subr.bf16.mxu1 %v1435_v54  ;;  %1216 = vmatprep.mubr.msk.f32.mxu1 %vm1436_vm12, %v1437_v26 }
 0x1c8   : > { %v766_v57 = vpop.permute.xlu1 %765 }
 0x1cc   : > { %v770_v39 = vpop.permute.xlu1 %769 }
 0x205   : > { %v559_v58 = vpop.permute.xlu1 %558 }
 0x209   : > { %v565_v14 = vpop.permute.xlu1 %564 }
 0x20a   : > { %v574_v15 = vsel %vm570_vm8, %v565_v14, %v559_v58  ;;  %v571_v21 = vsel %vm570_vm8, %v559_v58, %v565_v14  ;;  %v791_v14 = vld [vmem:[%s2003_s3] sm:$0x3] }
 0x20b   : > { %v581_v55 = vsel %vm420_vm9, %v574_v15, 0.0  ;;  %v654_v16 = vadd.f32 %v648_v43, %v571_v21 }
 0x20c   : > { %v653_v59 = vadd.f32 %v647_v5, %v581_v55 }
 0x20d   : > { %v561_v22 = vpop.permute.xlu0 %560  ;;  %v726_v10 = vpop.permute.xlu1 %725 }
 0x211   : > { %v567_v61 = vpop.permute.xlu0 %566  ;;  %v732_v41 = vpop.permute.xlu1 %731 }
 0x212   : > { %v738_v0 = vsel %vm737_vm10, %v726_v10, %v732_v41  ;;  %v741_v63 = vsel %vm737_vm10, %v732_v41, %v726_v10  ;;  %v575_v6 = vsel %vm570_vm8, %v567_v61, %v561_v22  ;;  %v572_v17 = vsel %vm570_vm8, %v561_v22, %v567_v61 }
 0x213   : > { %v749_v8 = vsel %vm423_vm11, %v741_v63, 0.0  ;;  %v754_v9 = vadd.f32 %v738_v0, %v653_v59  ;;  %v583_v13 = vsel %vm420_vm9, %v575_v6, 0.0  ;;  %v656_v23 = vadd.f32 %v650_v7, %v572_v17  ;;  %v871_v59 = vld [vmem:[%s2004_s4] sm:$0xff] }
 0x214   : > { %v755_v25 = vadd.f32 %v749_v8, %v654_v16  ;;  %v655_v29 = vadd.f32 %v649_v51, %v583_v13 }
 0x215   : > { %v728_v27 = vpop.permute.xlu0 %727  ;;  %v1875_v34 = vadd.f32 %v762_v24, %v754_v9  ;;  %v569_v11 = vpop.permute.xlu1 %568 }
 0x216   : > { %v1879_v40 = vadd.f32 %v762_v24, %v755_v25 }
 0x218   : > { %v778_v20 = vadd.f32 %v1879_v40, %v1875_v34 }
 0x219   : > { %v734_v32 = vpop.permute.xlu0 %733  ;;  %v736_v51 = vpop.permute.xlu1 %735 }
 0x21a   : > { %v739_v28 = vsel %vm737_vm10, %v728_v27, %v734_v32  ;;  %v742_v37 = vsel %vm737_vm10, %v734_v32, %v728_v27  ;;  %779 = vadd.xlane.f32.xlu0 %v778_v20 }
 0x21b   : > { %v751_v49 = vsel %vm423_vm11, %v742_v37, 0.0  ;;  %v756_v38 = vadd.f32 %v739_v28, %v655_v29 }
 0x21c   : > { %v757_v42 = vadd.f32 %v751_v49, %v656_v23 }
 0x21d   : > { %v563_v62 = vpop.permute.xlu0 %562  ;;  %v1891_v5 = vadd.f32 %v766_v57, %v756_v38 }
 0x21e   : > { %v576_v43 = vsel %vm570_vm8, %v569_v11, %v563_v62  ;;  %v1895_v47 = vadd.f32 %v766_v57, %v757_v42  ;;  %v573_v44 = vsel %vm570_vm8, %v563_v62, %v569_v11 }
 0x21f   : > { %v585_v48 = vsel %vm420_vm9, %v576_v43, 0.0  ;;  %v658_v19 = vadd.f32 %v652_v56, %v573_v44 }
 0x220   : > { %v657_v35 = vadd.f32 %v651_v3, %v585_v48  ;;  %v781_v36 = vadd.f32 %v1895_v47, %v1891_v5 }
 0x221   : > { %v730_v7 = vpop.permute.xlu0 %729 }
 0x222   : > { %v740_v12 = vsel %vm737_vm10, %v730_v7, %v736_v51  ;;  %v743_v45 = vsel %vm737_vm10, %v736_v51, %v730_v7  ;;  %782 = vadd.xlane.f32.xlu1 %v781_v36 }
 0x223   : > { %v753_v46 = vsel %vm423_vm11, %v743_v45, 0.0  ;;  %v758_v50 = vadd.f32 %v740_v12, %v657_v35 }
 0x224   : > { %v759_v60 = vadd.f32 %v753_v46, %v658_v19 }
 0x225   : > { %v1909_v52 = vadd.f32 %v770_v39, %v758_v50 }
 0x226   : > { %v1911_v53 = vadd.f32 %v770_v39, %v759_v60 }
 0x228   : > { %v784_v30 = vadd.f32 %v1911_v53, %v1909_v52 }
 0x22a   : > { %785 = vadd.xlane.f32.xlu0 %v784_v30 }
 0x233   : > { %874 = vrot.lane.b32.xlu1 %v1543_v2, %s1439_s16 }
 0x237   : > { %876 = vrot.lane.b32.xlu1 %v1554_v4, %s1439_s16  ;;  %v873_v4 = vld [vmem:[%s2004_s4 + $0x10] sm:$0xff] }
 0x240   : > { %793 = vrot.lane.b32.xlu0 %v282_v31, %s1438_s13  ;;  %s1176_s13 = sshll.u32 %s269_s9, 3 }
 0x241   : > { %s271_s15 = scalar_lea.vmem [#allocation2], %s1176_s13 }
 0x244   : > { %878 = vrot.lane.b32.xlu0 %v1535_v1, %s1439_s16  ;;  %v872_v1 = vld [vmem:[%s2004_s4 + $0x8] sm:$0xff]  ;;  %s1113_s16 = sshll.u32 %s271_s15, 4  ;;  %s1960_s16 = int_to_ptr.vmem [resolvable:$true] %s1113_s16 }
 0x245   : > { %s1358_s20 = scalar_lea.vmem %s1960_s16, 128  ;;  %p1365_p0 = scmp.lt.s32.totalorder %s1960_s16, %s1363_s21 }
 0x246   : > { %p1359_p11 = scmp.ne.s32.totalorder %s1960_s16, %s1358_s20  ;;  %p1366_p1 = scmp.lt.s32.totalorder %s1364_s22, %s1358_s20 }
 0x248   : > { %p1360_p12 = pnand %p1359_p11, %p1519_p5  ;;  %p1367_p2 = por %p1366_p1, %p1365_p0 }
 0x24a   : > { %p1361_p13 = pneg %p1360_p12 }
 0x24c   : > { %p1368_p3 = pnand %p1367_p2, %p1361_p13 }
 0x2a7   : > { %v780_v33 = vpop.xlane.xlu0 %779 }
 0x2a8   : > { %v788_v56 = vmul.f32 0.00390625, %v780_v33 }
 0x2af   : > { %v783_v3 = vpop.xlane.xlu1 %782 }
 0x2b0   : > { %v789_v57 = vmul.f32 0.00390625, %v783_v3 }
 0x2b2   : > { %v1231_v39 = vpack.c.bf16 %v789_v57, %v788_v56 }
 0x2b3   : > { %v875_v61 = vpop.permute.xlu1 %874 }
 0x2b4   : > { %1232 = vmatpush3.bf16.msra.mxu1 %v1231_v39 }
 0x2b5   : > { %1214 = vmatprep.subr.mxu1 %v1437_v26 }
 0x2b7   : > { %v786_v58 = vpop.xlane.xlu0 %785  ;;  %v877_v63 = vpop.permute.xlu1 %876 }
 0x2b8   : > { %v790_v24 = vmul.f32 0.00390625, %v786_v58 }
 0x2ba   : > { %1215 = vmatpush3.msra.mxu1 %v790_v24 }
 0x2bb   : > { %1217 = vmatmul.mubr.msk.f32.vlgmr.msra.gmra.mrb[0].mxu1 %vm796_vm13, %v791_v14  ;;  %1219 = vmatprep.subr.mxu1 %v1437_v26  ;;  %v794_v15 = vpop.permute.xlu0 %793 }
 0x2bc   : > { %1221 = vmatprep.mubr.msk.f32.mxu1 %vm1436_vm12, %v1437_v26 }
 0x2bf   : > { %v879_v13 = vpop.permute.xlu0 %878 }
 0x38e   : > { %v866_v22 = vpop.f32.mrb[0].mxu1 }
 0x38f   : > { %v867_v10 = vadd.f32 %v866_v22, %v794_v15  ;;  %v1218_v55 = vpop.f32.mrb[1].mxu1 }
 0x391   : > { %v870_v21 = vmax.f32 %v867_v10, 0.0 }
 0x393   : > { %1220 = vmatpush3.msk.msra.mxu1 %vm321_vm0, %v870_v21 }
 0x394   : > { %1222 = vmatmul.mubr.msk.f32.vlgmr.msra.gmra.mrb[2].mxu1 %vm883_vm14, %v871_v59 }
 0x395   : > { %1224 = vmatprep.mubr.msk.f32.mxu1 %vm1436_vm12, %v1437_v26 }
 0x398   : > { %1225 = vmatmul.mubr.msk.f32.gmra.mrb[4].mxu1 %vm883_vm14, %v872_v1 }
 0x399   : > { %1227 = vmatprep.mubr.msk.f32.mxu1 %vm1436_vm12, %v1437_v26 }
 0x39c   : > { %1228 = vmatmul.mubr.msk.f32.gmra.mrb[6].mxu1 %vm883_vm14, %v873_v4 }
 0x467   : > { %v962_v41 = vpop.f32.mrb[2].mxu1 }
 0x468   : > { %v963_v16 = vadd.f32 %v962_v41, %v875_v61  ;;  %v1223_v0 = vpop.f32.mrb[3].mxu1 }
 0x46a   : > { %v976_v6 = vsub.f32 0.0, %v963_v16 }
 0x46b   : > { %v967_v8 = vpop.f32.mrb[4].mxu1 }
 0x46c   : > { %v979_v9 = vmul.f32 1.442695, %v976_v6  ;;  %v968_v25 = vadd.f32 %v967_v8, %v877_v63  ;;  %v1226_v27 = vpop.f32.mrb[5].mxu1 }
 0x46e   : > { %1346 = vpow2.f32 %v979_v9  ;;  %v977_v17 = vsub.f32 0.0, %v968_v25 }
 0x46f   : > { %v972_v20 = vpop.f32.mrb[6].mxu1 }
 0x470   : > { %v981_v29 = vmul.f32 1.442695, %v977_v17  ;;  %v973_v32 = vadd.f32 %v972_v20, %v879_v13  ;;  %v1229_v23 = vpop.f32.mrb[7].mxu1 }
 0x472   : > { %1348 = vpow2.f32 %v981_v29  ;;  %v978_v28 = vsub.f32 0.0, %v973_v32 }
 0x474   : > { %v983_v37 = vmul.f32 1.442695, %v978_v28 }
 0x476   : > { %1350 = vpow2.f32 %v983_v37 }
 0x478   : > { %v1347_v11 = vpop.eup %1346 }
 0x479   : > { %v985_v49 = vadd.f32 1.0, %v1347_v11 }
 0x47b   : > { %1352 = vrcp.f32 %v985_v49 }
 0x47c   : > { %v1349_v38 = vpop.eup %1348 }
 0x47d   : > { %v986_v42 = vadd.f32 1.0, %v1349_v38 }
 0x47f   : > { %1354 = vrcp.f32 %v986_v42 }
 0x480   : > { %v1351_v62 = vpop.eup %1350 }
 0x481   : > { %v987_v43 = vadd.f32 1.0, %v1351_v62 }
 0x483   : > { %1356 = vrcp.f32 %v987_v43 }
 0x485   : > { %v1353_v44 = vpop.eup %1352 }
 0x486   : > { %993 = vperm.xlu1 %1314, %v1353_v44  }
 0x489   : > { %v1355_v48 = vpop.eup %1354 }
 0x48a   : > { %998 = vperm.xlu0 %1315, %v1355_v48  }
 0x48d   : > { %v1357_v35 = vpop.eup %1356 }
 0x48e   : > { %1003 = vperm.xlu1 %1314, %v1357_v35   ;;  %1317 = vset.pattern.permute.xlu0 %v1428_v18 }
 0x492   : > { %1316 = vset.pattern.permute.xlu1 %v1428_v18 }
 0x493   : > { %1030 = vperm.xlu1 %1316, %v1543_v2  }
 0x505   : > { %v994_v36 = vpop.permute.xlu1 %993 }
 0x506   : > { %v1006_v51 = vmul.f32 %v994_v36, %v1875_v34  ;;  %v1007_v7 = vmul.f32 %v994_v36, %v1879_v40 }
 0x508   : > { %v1012_v19 = vmax.f32 %v1006_v51, 0.0  ;;  %v1013_v12 = vmax.f32 %v1007_v7, 0.0 }
 0x509   : > { %v999_v45 = vpop.permute.xlu0 %998 }
 0x50a   : > { %v1008_v46 = vmul.f32 %v999_v45, %v1891_v5  ;;  %v1009_v50 = vmul.f32 %v999_v45, %v1895_v47  ;;  %v1018_v54 = vmin.f32 %v1012_v19, 6.0  ;;  %v1019_v26 = vmin.f32 %v1013_v12, 6.0 }
 0x50c   : > { %v1014_v60 = vmax.f32 %v1008_v46, 0.0  ;;  %v1015_v30 = vmax.f32 %v1009_v50, 0.0 }
 0x50d   : > { %v1004_v31 = vpop.permute.xlu1 %1003 }
 0x50e   : > { %v1020_v18 = vmin.f32 %v1014_v60, 6.0  ;;  %v1021_v33 = vmin.f32 %v1015_v30, 6.0  ;;  %v1010_v2 = vmul.f32 %v1004_v31, %v1909_v52  ;;  %v1011_v34 = vmul.f32 %v1004_v31, %v1911_v53  ;;  %v1024_v52 = vld [vmem:[%s2005_s5] sm:$0xf] }
 0x50f   : > { %v1084_v53 = vld [vmem:[%s1559_s8] sm:$0xff]  ;;  %s1958_s8 = scalar_lea.hbm %s2007_s7, %s1201_s14 }
 0x510   : > { %v1025_v3 = vpack.c.bf16 %v1020_v18, %v1018_v54  ;;  %v1026_v40 = vpack.c.bf16 %v1021_v33, %v1019_v26  ;;  %v1016_v56 = vmax.f32 %v1010_v2, 0.0  ;;  %v1017_v57 = vmax.f32 %v1011_v34, 0.0 }
 0x511   : > { %v1085_v15 = vunpack.c.l.bf16 %v1084_v53  ;;  %v1086_v10 = vunpack.c.h.bf16 %v1084_v53 }
 0x512   : > { %v1022_v5 = vmin.f32 %v1016_v56, 6.0  ;;  %v1023_v39 = vmin.f32 %v1017_v57, 6.0  ;;  %1043 = vmatprep.subr.bf16.mxu0 %v1026_v40  ;;  %v1031_v14 = vpop.permute.xlu1 %1030 }
 0x513   : > { %1044 = vmatpush1.bf16.msra.mxu0 %v1025_v3 }
 0x514   : > { %v1027_v47 = vpack.c.bf16 %v1022_v5, %v1022_v5  ;;  %v1028_v58 = vpack.c.bf16 %v1023_v39, %v1023_v39 }
 0x516   : > { %1191 = vmatprep.subr.msk.bf16.mxu0 %vm1036_vm15, %v1028_v58  ;;  %v1038_v24 = vsel %vm1036_vm15, %v1027_v47, 0 }
 0x517   : > { %1046 = vmatpush1.bf16.msra.mxu0 %v1038_v24 }
 0x51a   : > { %1192 = vmatmul.mubr.msk.bf16.vlgmr.msra.gmra.mrb[8].mxu0 %vm796_vm13, %v1024_v52 }
 0x5ed   : > { %v1077_v22 = vpop.f32.mrb[8].mxu0 }
 0x5ee   : > { %v1079_v55 = vpop.f32.mrb[9].mxu0  ;;  %v1078_v21 = vadd.f32 %v1077_v22, %v1031_v14 }
 0x5ef   : > { %v1081_v59 = vpop.f32.mrb[10].mxu0  ;;  %v1080_v1 = vadd.f32 %v1079_v55, %v1031_v14 }
 0x5f0   : > { %v1082_v4 = vpop.f32.mrb[11].mxu0  ;;  %v1087_v61 = vadd.f32 %v1085_v15, %v1078_v21 }
 0x5f1   : > { %v1088_v41 = vadd.f32 %v1086_v10, %v1080_v1 }
 0x5f3   : > { %v1200_v16 = vpack.c.bf16 %v1088_v41, %v1087_v61 }
 0x5f5   : > { %1097 = vst [vmem:[%s271_s15] sm:$0xff] %v1200_v16 }
 0x5f6   : > { %1371 = shalt.err (!%p1368_p3)
}
 0x5f7   : > { %s1372_s23 = scalar_lea.hbm %s1958_s8, 128  ;;  %s1376_s13 = scalar_lea.hbm %s2007_s7, 256 }
 0x5f8   : > { %p1373_p4 = scmp.ne.s32.totalorder %s1958_s8, %s1372_s23  ;;  %p1377_p9 = scmp.lt.u32.totalorder %s1958_s8, %s2007_s7 }
 0x5f9   : > { %p1378_p10 = scmp.lt.u32.totalorder %s1376_s13, %s1372_s23  ;;  %p1380_p12 = scmp.lt.u32.totalorder %s1372_s23, %s1958_s8 }
 0x5fa   : > { %p1374_p7 = pnand %p1373_p4, %p1519_p5 }
 0x5fb   : > { %p1379_p11 = por %p1378_p10, %p1377_p9 }
 0x5fc   : > { %p1375_p8 = pneg %p1374_p7 }
 0x5fd   : > { %p1381_p13 = por %p1380_p12, %p1379_p11 }
 0x5ff   : > { %p1382_p0 = pnand %p1381_p13, %p1375_p8 }
 0x601   : > { %1385 = shalt.err (!%p1382_p0)
}
 0x602   : > { %1233 = dma.vmem_to_hbm [thread:$0]  (%p1519_p5), %s1960_s16, 128, %s1958_s8, %s1099_s19  }
 0x603 PF: > { %p1239_p1 = scmp.ge.s32.totalorder %s1420_s27, 2  ;;  %s1125_s17 = sand.u32 1, %s1408_s24  }
 0x604   : > { %s1126_s18 = scalar_lea.sflag [#allocation3], %s1125_s17 }
 0x605   : > { %p1236_p2 = pnand %p1239_p1, %p1523_p6 }
 0x607   : > { %1403 = dma.done.wait (!%p1236_p2), %s1126_s18, 128  }
 0x608   : > { %1405 = vsyncadd (!%p1236_p2), %s1126_s18, 4294967168  ;;  %p17_p3 = scmp.ge.s32.totalorder %s1506_s30, 4   ;;  %s2018_s24 = smov %s1412_s25 }
 0x609   : > { %s2019_s25 = smov %s1416_s26  ;;  %s2020_s26 = smov %s1517_s10 }
 0x60a   : > { %s2021_s27 = smov %s1506_s30  ;;  %19 = sbr.rel (!%p17_p3) target bundleno = 3 (0x3), region = 83 }
 0x611   :  { %1131 = vsyncpa [#allocation3], 1 }
 0x612   :  { %1133 = vsyncpa [#allocation3 + $0x1], 1 }

</bundles_post_ra>
